<compile_context>
chip_gen: v6e
topology: v6e:2x2x1
jax: 0.10.0
libtpu: 0.0.40
codegen_flags: <defaults>
</compile_context>

<pallas_src>
import functools

import jax
import jax.numpy as jnp
from jax.experimental import pallas as pl
from jax.experimental.pallas import tpu as pltpu

# ---- module hyper-parameters (small/synthetic where the original pulls from a tokenizer) ----
NEMB = 112           # nemb from the module
NEMB_PAD = 128       # lane-aligned feature dim used inside the kernel
HID = 4 * NEMB       # 448
HID_PAD = 512        # lane/MXU-aligned FFN hidden dim (zero-padded, numerically exact)
NHEAD = 2            # unused for the output (heads are discarded), kept for parity
NLAYERS = 1
BLOCKSIZ = 128       # max context; only needs to be >= T here
VOCAB = 512          # synthetic stand-in for tokenizer.vocab_size (kept small, 128-aligned)
LN_EPS = 1e-5


def _round_up(x, m):
    return pl.cdiv(x, m) * m


def _layernorm(v, g, b):
    """LayerNorm over the first NEMB lanes of an NEMB_PAD-wide f32 tile.

    Padded lanes of `v` are exactly zero and g/b are zero-padded, so:
      * sum(v) and sum(v*v) only see the real 112 lanes (no mask multiply needed),
      * the output is exactly zero in padded lanes ((0 - mean)*rsqrt*0 + 0).
    var = E[x^2] - mean^2 equals PyTorch's biased variance."""
    mean = jnp.sum(v, axis=-1, keepdims=True) * (1.0 / NEMB)
    var = jnp.sum(v * v, axis=-1, keepdims=True) * (1.0 / NEMB) - mean * mean
    return (v - mean) * jax.lax.rsqrt(var + LN_EPS) * g + b


def gpt_forward_kernel(
    x_ref,                      # (TM, NEMB_PAD) bf16 row tile of tok+pos embeddings
    ln1g_ref, ln1b_ref,         # (1, NEMB_PAD) f32
    wp_ref, bp_ref,             # (NEMB_PAD, NEMB_PAD) bf16, (1, NEMB_PAD) f32
    ln2g_ref, ln2b_ref,         # (1, NEMB_PAD) f32
    w1_ref, b1_ref,             # (NEMB_PAD, HID_PAD) bf16, (1, HID_PAD) f32
    w2_ref, b2_ref,             # (HID_PAD, NEMB_PAD) bf16, (1, NEMB_PAD) f32
    lnfg_ref, lnfb_ref,         # (1, NEMB_PAD) f32
    wlm_ref, blm_ref,           # (NEMB_PAD, VOCAB) bf16, (1, VOCAB) f32
    out_ref,                    # (TM, VOCAB) out_dtype (default bf16)
):
    # residual stream kept in f32; padded lanes stay exactly zero throughout
    x = x_ref[...].astype(jnp.float32)

    # --- Block (nlayers == 1) ---
    # x = x + self_attn(ln_1(x))   with self_attn(h) == dropout(proj(h)) in the source
    h = _layernorm(x, ln1g_ref[...], ln1b_ref[...])
    x = x + (
        jnp.dot(h.astype(jnp.bfloat16), wp_ref[...],
                preferred_element_type=jnp.float32)
        + bp_ref[...]
    )

    # x = x + ffn(ln_2(x))         FFN = Linear -> ReLU -> Linear -> Dropout(eval=id)
    h = _layernorm(x, ln2g_ref[...], ln2b_ref[...])
    h = (
        jnp.dot(h.astype(jnp.bfloat16), w1_ref[...],
                preferred_element_type=jnp.float32)
        + b1_ref[...]
    )
    h = jnp.maximum(h, 0.0)
    x = x + (
        jnp.dot(h.astype(jnp.bfloat16), w2_ref[...],
                preferred_element_type=jnp.float32)
        + b2_ref[...]
    )

    # --- final LayerNorm + lm_head --- (f32 accumulation; cast only at the store)
    h = _layernorm(x, lnfg_ref[...], lnfb_ref[...])
    logits = (
        jnp.dot(h.astype(jnp.bfloat16), wlm_ref[...],
                preferred_element_type=jnp.float32)
        + blm_ref[...]
    )
    out_ref[...] = logits.astype(out_ref.dtype)


_PARAM_ORDER = (
    "ln1_g", "ln1_b", "wp", "bp", "ln2_g", "ln2_b",
    "w1", "b1", "w2", "b2", "lnf_g", "lnf_b", "wlm", "blm",
)


def _pad2(a, shape, dtype):
    """Zero-pad a 2-D array up to `shape` and cast to `dtype`."""
    out = jnp.zeros(shape, dtype)
    return out.at[: a.shape[0], : a.shape[1]].set(a.astype(dtype))


def prepare_params(p):
    """One-time (outside the per-call jit) pad/cast of all weights:
    matmul weights + embedding tables in bf16, LN params & biases in f32,
    feature dim 112->128 and FFN hidden 448->512 zero-padded."""
    kp = {
        "ln1_g": _pad2(p["ln1_g"], (1, NEMB_PAD), jnp.float32),
        "ln1_b": _pad2(p["ln1_b"], (1, NEMB_PAD), jnp.float32),
        "wp":    _pad2(p["wp"], (NEMB_PAD, NEMB_PAD), jnp.bfloat16),
        "bp":    _pad2(p["bp"], (1, NEMB_PAD), jnp.float32),
        "ln2_g": _pad2(p["ln2_g"], (1, NEMB_PAD), jnp.float32),
        "ln2_b": _pad2(p["ln2_b"], (1, NEMB_PAD), jnp.float32),
        "w1":    _pad2(p["w1"], (NEMB_PAD, HID_PAD), jnp.bfloat16),
        "b1":    _pad2(p["b1"], (1, HID_PAD), jnp.float32),
        "w2":    _pad2(p["w2"], (HID_PAD, NEMB_PAD), jnp.bfloat16),
        "b2":    _pad2(p["b2"], (1, NEMB_PAD), jnp.float32),
        "lnf_g": _pad2(p["lnf_g"], (1, NEMB_PAD), jnp.float32),
        "lnf_b": _pad2(p["lnf_b"], (1, NEMB_PAD), jnp.float32),
        "wlm":   _pad2(p["wlm"], (NEMB_PAD, VOCAB), jnp.bfloat16),
        "blm":   _pad2(p["blm"], (1, VOCAB), jnp.float32),
        # embedding tables pre-padded to 128 lanes + pre-cast to bf16 so the
        # wrapper's gather produces kernel-ready rows with no f32 HBM round trip.
        "wte":   _pad2(p["wte"], (VOCAB, NEMB_PAD), jnp.bfloat16),
        "wpe":   _pad2(p["wpe"], (BLOCKSIZ, NEMB_PAD), jnp.bfloat16),
    }
    return kp


def _pick_tile(n_rows, row_tile):
    """Row tile: as large as requested, clamped to the (8-aligned) row count,
    then shrunk while ragged-N padding waste would exceed ~12.5% of real rows."""
    tile = max(8, min(_round_up(row_tile, 8), _round_up(n_rows, 8)))
    while tile > 8 and (_round_up(n_rows, tile) - n_rows) * 8 > n_rows:
        tile = max(8, _round_up(tile // 2, 8))
    return tile


def gpt_forward_pallas(x_rows, kparams, *, row_tile=1024, out_dtype=jnp.bfloat16):
    """x_rows: (N, NEMB_PAD) bf16 lane-padded activations.
    Returns logits (N, VOCAB) in out_dtype (f32 accumulation inside the kernel)."""
    n_rows = x_rows.shape[0]
    tile = _pick_tile(n_rows, row_tile)
    n_pad = _round_up(n_rows, tile)

    # Zero-pad ragged rows only (lanes are already padded by the embedding tables).
    x_pad = jnp.pad(x_rows, ((0, n_pad - n_rows), (0, 0)))

    def full(shape):
        # Whole-array parameter block, same for every grid step.
        # NOTE: pl.Buffered(1) single-buffering would free ~0.5 MiB of duplicate
        # buffers; skipped since the whole parameter set is < 0.5 MiB here.
        return pl.BlockSpec(shape, lambda i: (0,) * len(shape))

    in_specs = [pl.BlockSpec((tile, NEMB_PAD), lambda i: (i, 0))]
    in_specs += [full(kparams[name].shape) for name in _PARAM_ORDER]

    grid_spec = pltpu.PrefetchScalarGridSpec(
        num_scalar_prefetch=0,
        grid=(n_pad // tile,),
        in_specs=in_specs,
        out_specs=pl.BlockSpec((tile, VOCAB), lambda i: (i, 0)),
    )

    out_itemsize = jnp.finfo(out_dtype).bits // 8
    param_bytes = sum(int(kparams[n].size) * kparams[n].dtype.itemsize
                      for n in _PARAM_ORDER)
    flops_per_row = 2 * (
        NEMB_PAD * NEMB_PAD + NEMB_PAD * HID_PAD + HID_PAD * NEMB_PAD + NEMB_PAD * VOCAB
    )
    cost = pl.CostEstimate(
        flops=int(flops_per_row * n_pad),
        transcendentals=int(3 * n_pad),                 # 3 rsqrt per row (LayerNorms)
        bytes_accessed=int(n_pad * NEMB_PAD * 2
                           + n_pad * VOCAB * out_itemsize
                           + param_bytes),
    )

    # Scoped-VMEM budget: double-buffered x & out tiles + params + f32 intermediates,
    # with 2x margin; clamped to stay safely below v7x's 64 MiB physical VMEM.
    vmem_est = (
        2 * tile * NEMB_PAD * 2                         # bf16 input tile, double-buffered
        + 2 * tile * VOCAB * out_itemsize               # output tile, double-buffered
        + 2 * param_bytes                               # parameter blocks
        + tile * (2 * NEMB_PAD + HID_PAD + VOCAB) * 4   # f32 residual/hidden/logit temps
    )
    vmem_limit = int(min(max(2 * vmem_est, 32 << 20), 48 << 20))

    logits = pl.pallas_call(
        gpt_forward_kernel,
        out_shape=jax.ShapeDtypeStruct((n_pad, VOCAB), out_dtype),
        grid_spec=grid_spec,
        compiler_params=pltpu.CompilerParams(
            dimension_semantics=("parallel",),
            vmem_limit_bytes=vmem_limit,
        ),
        cost_estimate=cost,
    )(x_pad, *(kparams[name] for name in _PARAM_ORDER))

    return logits[:n_rows]


def init_params(key):
    """Deterministic synthetic weights, matching the module's _init_weights:
    Linear/Embedding weights ~ N(0, 0.02), biases zero, LayerNorm gamma=1 beta=0.
    Linear weights are stored pre-transposed so y = x @ W + b (f32, unpadded)."""
    ks = jax.random.split(key, 8)
    std = 0.02
    return {
        "wte": jax.random.normal(ks[0], (VOCAB, NEMB), jnp.float32) * std,
        "wpe": jax.random.normal(ks[1], (BLOCKSIZ, NEMB), jnp.float32) * std,
        "ln1_g": jnp.ones((1, NEMB), jnp.float32),
        "ln1_b": jnp.zeros((1, NEMB), jnp.float32),
        "wp": jax.random.normal(ks[2], (NEMB, NEMB), jnp.float32) * std,
        "bp": jnp.zeros((1, NEMB), jnp.float32),
        "ln2_g": jnp.ones((1, NEMB), jnp.float32),
        "ln2_b": jnp.zeros((1, NEMB), jnp.float32),
        "w1": jax.random.normal(ks[3], (NEMB, HID), jnp.float32) * std,
        "b1": jnp.zeros((1, HID), jnp.float32),
        "w2": jax.random.normal(ks[4], (HID, NEMB), jnp.float32) * std,
        "b2": jnp.zeros((1, NEMB), jnp.float32),
        "lnf_g": jnp.ones((1, NEMB), jnp.float32),
        "lnf_b": jnp.zeros((1, NEMB), jnp.float32),
        "wlm": jax.random.normal(ks[5], (NEMB, VOCAB), jnp.float32) * std,
        "blm": jnp.zeros((1, VOCAB), jnp.float32),
    }


@functools.partial(jax.jit, static_argnames=("row_tile",))
def gpt_language_model_forward(ix, kparams, row_tile=1024):
    """ix: (B, T) int32 token ids; kparams = prepare_params(params) (cached).
    Returns logits (B, T, VOCAB) in bf16 (f32-accumulated, cast at the store);
    the loss path (targt) is None in the reference call, so it is omitted."""
    B, T = ix.shape
    # bf16 gather + positional add on the pre-padded tables: the kernel input slab
    # is produced directly as lane-padded bf16 (no separate f32 slab + re-cast).
    x = kparams["wte"][ix] + kparams["wpe"][:T][None, :, :]    # (B, T, NEMB_PAD) bf16
    x_rows = x.reshape(B * T, NEMB_PAD)
    logits_rows = gpt_forward_pallas(x_rows, kparams, row_tile=row_tile)
    return logits_rows.reshape(B, T, VOCAB)


def _layernorm_ref(v, g, b):
    mu = jnp.mean(v, axis=-1, keepdims=True)
    var = jnp.mean((v - mu) ** 2, axis=-1, keepdims=True)
    return (v - mu) * jax.lax.rsqrt(var + LN_EPS) * g + b


def _reference_forward(ix, p):
    """Pure-JAX f32 reference mirroring the PyTorch forward (sanity check)."""
    B, T = ix.shape
    x = p["wte"][ix] + p["wpe"][jnp.arange(T)][None]
    h = _layernorm_ref(x, p["ln1_g"][0], p["ln1_b"][0])
    x = x + h @ p["wp"] + p["bp"][0]
    h = _layernorm_ref(x, p["ln2_g"][0], p["ln2_b"][0])
    h = jnp.maximum(h @ p["w1"] + p["b1"][0], 0.0)
    x = x + h @ p["w2"] + p["b2"][0]
    h = _layernorm_ref(x, p["lnf_g"][0], p["lnf_b"][0])
    return h @ p["wlm"] + p["blm"][0]


if __name__ == "__main__":
    key = jax.random.PRNGKey(0)
    pkey, xkey = jax.random.split(key)
    params = init_params(pkey)
    kparams = prepare_params(params)      # one-time pad/cast, hoisted out of the call path

    B, T = 2, 8
    ix = jax.random.randint(xkey, (B, T), 0, VOCAB, dtype=jnp.int32)

    logits = gpt_language_model_forward(ix, kparams)
    jax.block_until_ready(logits)

    ref = _reference_forward(ix, params)
    assert logits.shape == (B, T, VOCAB)
    # bf16 embeddings / MXU operands / logit store vs. the pure-f32 reference.
    assert jnp.allclose(logits.astype(jnp.float32), ref, atol=5e-2, rtol=5e-2)

    print("KERNEL_OK")
</pallas_src>

<mosaic_0001>
module attributes {stable_mosaic.version = 11 : i64} {
  func.func @gpt_forward_kernel(%arg0: i32, %arg1: memref<16x128xbf16, #tpu.memory_space<vmem>>, %arg2: memref<1x128xf32, #tpu.memory_space<vmem>>, %arg3: memref<1x128xf32, #tpu.memory_space<vmem>>, %arg4: memref<128x128xbf16, #tpu.memory_space<vmem>>, %arg5: memref<1x128xf32, #tpu.memory_space<vmem>>, %arg6: memref<1x128xf32, #tpu.memory_space<vmem>>, %arg7: memref<1x128xf32, #tpu.memory_space<vmem>>, %arg8: memref<128x512xbf16, #tpu.memory_space<vmem>>, %arg9: memref<1x512xf32, #tpu.memory_space<vmem>>, %arg10: memref<512x128xbf16, #tpu.memory_space<vmem>>, %arg11: memref<1x128xf32, #tpu.memory_space<vmem>>, %arg12: memref<1x128xf32, #tpu.memory_space<vmem>>, %arg13: memref<1x128xf32, #tpu.memory_space<vmem>>, %arg14: memref<128x512xbf16, #tpu.memory_space<vmem>>, %arg15: memref<1x512xf32, #tpu.memory_space<vmem>>, %arg16: memref<16x512xbf16, #tpu.memory_space<vmem>>) attributes {dimension_semantics = [#tpu.dimension_semantics<parallel>], iteration_bounds = array<i64: 1>, scalar_prefetch = 0 : i64, scratch_operands = 0 : i64, tpu.core_type = #tpu.core_type<tc>, window_params = [{transform_indices = @transform_0, window_bounds = array<i64: 16, 128>}, {pipeline_mode = #tpu.pipeline_mode<synchronous>, transform_indices = @transform_1, window_bounds = array<i64: 1, 128>}, {pipeline_mode = #tpu.pipeline_mode<synchronous>, transform_indices = @transform_2, window_bounds = array<i64: 1, 128>}, {pipeline_mode = #tpu.pipeline_mode<synchronous>, transform_indices = @transform_3, window_bounds = array<i64: 128, 128>}, {pipeline_mode = #tpu.pipeline_mode<synchronous>, transform_indices = @transform_4, window_bounds = array<i64: 1, 128>}, {pipeline_mode = #tpu.pipeline_mode<synchronous>, transform_indices = @transform_5, window_bounds = array<i64: 1, 128>}, {pipeline_mode = #tpu.pipeline_mode<synchronous>, transform_indices = @transform_6, window_bounds = array<i64: 1, 128>}, {pipeline_mode = #tpu.pipeline_mode<synchronous>, transform_indices = @transform_7, window_bounds = array<i64: 128, 512>}, {pipeline_mode = #tpu.pipeline_mode<synchronous>, transform_indices = @transform_8, window_bounds = array<i64: 1, 512>}, {pipeline_mode = #tpu.pipeline_mode<synchronous>, transform_indices = @transform_9, window_bounds = array<i64: 512, 128>}, {pipeline_mode = #tpu.pipeline_mode<synchronous>, transform_indices = @transform_10, window_bounds = array<i64: 1, 128>}, {pipeline_mode = #tpu.pipeline_mode<synchronous>, transform_indices = @transform_11, window_bounds = array<i64: 1, 128>}, {pipeline_mode = #tpu.pipeline_mode<synchronous>, transform_indices = @transform_12, window_bounds = array<i64: 1, 128>}, {pipeline_mode = #tpu.pipeline_mode<synchronous>, transform_indices = @transform_13, window_bounds = array<i64: 128, 512>}, {pipeline_mode = #tpu.pipeline_mode<synchronous>, transform_indices = @transform_14, window_bounds = array<i64: 1, 512>}, {transform_indices = @transform_15, window_bounds = array<i64: 16, 512>}]} {
    %c0 = arith.constant 0 : index
    %c0_0 = arith.constant 0 : index
    %0 = vector.load %arg1[%c0, %c0_0] : memref<16x128xbf16, #tpu.memory_space<vmem>>, vector<16x128xbf16>
    %1 = arith.extf %0 : vector<16x128xbf16> to vector<16x128xf32>
    %c0_1 = arith.constant 0 : index
    %c0_2 = arith.constant 0 : index
    %2 = vector.load %arg2[%c0_1, %c0_2] : memref<1x128xf32, #tpu.memory_space<vmem>>, vector<1x128xf32>
    %c0_3 = arith.constant 0 : index
    %c0_4 = arith.constant 0 : index
    %3 = vector.load %arg3[%c0_3, %c0_4] : memref<1x128xf32, #tpu.memory_space<vmem>>, vector<1x128xf32>
    %cst = arith.constant dense<0.000000e+00> : vector<16xf32>
    %4 = vector.multi_reduction <add>, %1, %cst [1] : vector<16x128xf32> to vector<16xf32>
    %5 = vector.shape_cast %4 : vector<16xf32> to vector<16x1xf32>
    %cst_5 = arith.constant 0.00892857183 : f32
    %6 = vector.broadcast %cst_5 : f32 to vector<16x1xf32>
    %7 = arith.mulf %5, %6 : vector<16x1xf32>
    %8 = arith.mulf %1, %1 : vector<16x128xf32>
    %cst_6 = arith.constant dense<0.000000e+00> : vector<16xf32>
    %9 = vector.multi_reduction <add>, %8, %cst_6 [1] : vector<16x128xf32> to vector<16xf32>
    %10 = vector.shape_cast %9 : vector<16xf32> to vector<16x1xf32>
    %cst_7 = arith.constant 0.00892857183 : f32
    %11 = vector.broadcast %cst_7 : f32 to vector<16x1xf32>
    %12 = arith.mulf %10, %11 : vector<16x1xf32>
    %13 = arith.mulf %7, %7 : vector<16x1xf32>
    %14 = arith.subf %12, %13 : vector<16x1xf32>
    %15 = vector.broadcast %7 : vector<16x1xf32> to vector<16x128xf32>
    %16 = arith.subf %1, %15 : vector<16x128xf32>
    %cst_8 = arith.constant 9.99999974E-6 : f32
    %17 = vector.broadcast %cst_8 : f32 to vector<16x1xf32>
    %18 = arith.addf %14, %17 : vector<16x1xf32>
    %19 = math.rsqrt %18 : vector<16x1xf32>
    %20 = vector.broadcast %19 : vector<16x1xf32> to vector<16x128xf32>
    %21 = arith.mulf %16, %20 : vector<16x128xf32>
    %22 = vector.broadcast %2 : vector<1x128xf32> to vector<16x128xf32>
    %23 = arith.mulf %21, %22 : vector<16x128xf32>
    %24 = vector.broadcast %3 : vector<1x128xf32> to vector<16x128xf32>
    %25 = arith.addf %23, %24 : vector<16x128xf32>
    %26 = arith.truncf %25 : vector<16x128xf32> to vector<16x128xbf16>
    %c0_9 = arith.constant 0 : index
    %c0_10 = arith.constant 0 : index
    %27 = vector.load %arg4[%c0_9, %c0_10] : memref<128x128xbf16, #tpu.memory_space<vmem>>, vector<128x128xbf16>
    %cst_11 = arith.constant dense<0.000000e+00> : vector<16x128xf32>
    %28 = tpu.matmul %26, %27, %cst_11 {dimension_numbers = #tpu.dot_dimension_numbers<[1], [0], [0], [1], [0, 0, 1, 1], [], []>} : vector<16x128xbf16>, vector<128x128xbf16>, vector<16x128xf32> -> vector<16x128xf32>
    %c0_12 = arith.constant 0 : index
    %c0_13 = arith.constant 0 : index
    %29 = vector.load %arg5[%c0_12, %c0_13] : memref<1x128xf32, #tpu.memory_space<vmem>>, vector<1x128xf32>
    %30 = vector.broadcast %29 : vector<1x128xf32> to vector<16x128xf32>
    %31 = arith.addf %28, %30 : vector<16x128xf32>
    %32 = arith.addf %1, %31 : vector<16x128xf32>
    %c0_14 = arith.constant 0 : index
    %c0_15 = arith.constant 0 : index
    %33 = vector.load %arg6[%c0_14, %c0_15] : memref<1x128xf32, #tpu.memory_space<vmem>>, vector<1x128xf32>
    %c0_16 = arith.constant 0 : index
    %c0_17 = arith.constant 0 : index
    %34 = vector.load %arg7[%c0_16, %c0_17] : memref<1x128xf32, #tpu.memory_space<vmem>>, vector<1x128xf32>
    %cst_18 = arith.constant dense<0.000000e+00> : vector<16xf32>
    %35 = vector.multi_reduction <add>, %32, %cst_18 [1] : vector<16x128xf32> to vector<16xf32>
    %36 = vector.shape_cast %35 : vector<16xf32> to vector<16x1xf32>
    %cst_19 = arith.constant 0.00892857183 : f32
    %37 = vector.broadcast %cst_19 : f32 to vector<16x1xf32>
    %38 = arith.mulf %36, %37 : vector<16x1xf32>
    %39 = arith.mulf %32, %32 : vector<16x128xf32>
    %cst_20 = arith.constant dense<0.000000e+00> : vector<16xf32>
    %40 = vector.multi_reduction <add>, %39, %cst_20 [1] : vector<16x128xf32> to vector<16xf32>
    %41 = vector.shape_cast %40 : vector<16xf32> to vector<16x1xf32>
    %cst_21 = arith.constant 0.00892857183 : f32
    %42 = vector.broadcast %cst_21 : f32 to vector<16x1xf32>
    %43 = arith.mulf %41, %42 : vector<16x1xf32>
    %44 = arith.mulf %38, %38 : vector<16x1xf32>
    %45 = arith.subf %43, %44 : vector<16x1xf32>
    %46 = vector.broadcast %38 : vector<16x1xf32> to vector<16x128xf32>
    %47 = arith.subf %32, %46 : vector<16x128xf32>
    %cst_22 = arith.constant 9.99999974E-6 : f32
    %48 = vector.broadcast %cst_22 : f32 to vector<16x1xf32>
    %49 = arith.addf %45, %48 : vector<16x1xf32>
    %50 = math.rsqrt %49 : vector<16x1xf32>
    %51 = vector.broadcast %50 : vector<16x1xf32> to vector<16x128xf32>
    %52 = arith.mulf %47, %51 : vector<16x128xf32>
    %53 = vector.broadcast %33 : vector<1x128xf32> to vector<16x128xf32>
    %54 = arith.mulf %52, %53 : vector<16x128xf32>
    %55 = vector.broadcast %34 : vector<1x128xf32> to vector<16x128xf32>
    %56 = arith.addf %54, %55 : vector<16x128xf32>
    %57 = arith.truncf %56 : vector<16x128xf32> to vector<16x128xbf16>
    %c0_23 = arith.constant 0 : index
    %c0_24 = arith.constant 0 : index
    %58 = vector.load %arg8[%c0_23, %c0_24] : memref<128x512xbf16, #tpu.memory_space<vmem>>, vector<128x512xbf16>
    %cst_25 = arith.constant dense<0.000000e+00> : vector<16x512xf32>
    %59 = tpu.matmul %57, %58, %cst_25 {dimension_numbers = #tpu.dot_dimension_numbers<[1], [0], [0], [1], [0, 0, 1, 1], [], []>} : vector<16x128xbf16>, vector<128x512xbf16>, vector<16x512xf32> -> vector<16x512xf32>
    %c0_26 = arith.constant 0 : index
    %c0_27 = arith.constant 0 : index
    %60 = vector.load %arg9[%c0_26, %c0_27] : memref<1x512xf32, #tpu.memory_space<vmem>>, vector<1x512xf32>
    %61 = vector.broadcast %60 : vector<1x512xf32> to vector<16x512xf32>
    %62 = arith.addf %59, %61 : vector<16x512xf32>
    %cst_28 = arith.constant 0.000000e+00 : f32
    %63 = vector.broadcast %cst_28 : f32 to vector<16x512xf32>
    %64 = arith.maximumf %62, %63 : vector<16x512xf32>
    %65 = arith.truncf %64 : vector<16x512xf32> to vector<16x512xbf16>
    %c0_29 = arith.constant 0 : index
    %c0_30 = arith.constant 0 : index
    %66 = vector.load %arg10[%c0_29, %c0_30] : memref<512x128xbf16, #tpu.memory_space<vmem>>, vector<512x128xbf16>
    %cst_31 = arith.constant dense<0.000000e+00> : vector<16x128xf32>
    %67 = tpu.matmul %65, %66, %cst_31 {dimension_numbers = #tpu.dot_dimension_numbers<[1], [0], [0], [1], [0, 0, 1, 1], [], []>} : vector<16x512xbf16>, vector<512x128xbf16>, vector<16x128xf32> -> vector<16x128xf32>
    %c0_32 = arith.constant 0 : index
    %c0_33 = arith.constant 0 : index
    %68 = vector.load %arg11[%c0_32, %c0_33] : memref<1x128xf32, #tpu.memory_space<vmem>>, vector<1x128xf32>
    %69 = vector.broadcast %68 : vector<1x128xf32> to vector<16x128xf32>
    %70 = arith.addf %67, %69 : vector<16x128xf32>
    %71 = arith.addf %32, %70 : vector<16x128xf32>
    %c0_34 = arith.constant 0 : index
    %c0_35 = arith.constant 0 : index
    %72 = vector.load %arg12[%c0_34, %c0_35] : memref<1x128xf32, #tpu.memory_space<vmem>>, vector<1x128xf32>
    %c0_36 = arith.constant 0 : index
    %c0_37 = arith.constant 0 : index
    %73 = vector.load %arg13[%c0_36, %c0_37] : memref<1x128xf32, #tpu.memory_space<vmem>>, vector<1x128xf32>
    %cst_38 = arith.constant dense<0.000000e+00> : vector<16xf32>
    %74 = vector.multi_reduction <add>, %71, %cst_38 [1] : vector<16x128xf32> to vector<16xf32>
    %75 = vector.shape_cast %74 : vector<16xf32> to vector<16x1xf32>
    %cst_39 = arith.constant 0.00892857183 : f32
    %76 = vector.broadcast %cst_39 : f32 to vector<16x1xf32>
    %77 = arith.mulf %75, %76 : vector<16x1xf32>
    %78 = arith.mulf %71, %71 : vector<16x128xf32>
    %cst_40 = arith.constant dense<0.000000e+00> : vector<16xf32>
    %79 = vector.multi_reduction <add>, %78, %cst_40 [1] : vector<16x128xf32> to vector<16xf32>
    %80 = vector.shape_cast %79 : vector<16xf32> to vector<16x1xf32>
    %cst_41 = arith.constant 0.00892857183 : f32
    %81 = vector.broadcast %cst_41 : f32 to vector<16x1xf32>
    %82 = arith.mulf %80, %81 : vector<16x1xf32>
    %83 = arith.mulf %77, %77 : vector<16x1xf32>
    %84 = arith.subf %82, %83 : vector<16x1xf32>
    %85 = vector.broadcast %77 : vector<16x1xf32> to vector<16x128xf32>
    %86 = arith.subf %71, %85 : vector<16x128xf32>
    %cst_42 = arith.constant 9.99999974E-6 : f32
    %87 = vector.broadcast %cst_42 : f32 to vector<16x1xf32>
    %88 = arith.addf %84, %87 : vector<16x1xf32>
    %89 = math.rsqrt %88 : vector<16x1xf32>
    %90 = vector.broadcast %89 : vector<16x1xf32> to vector<16x128xf32>
    %91 = arith.mulf %86, %90 : vector<16x128xf32>
    %92 = vector.broadcast %72 : vector<1x128xf32> to vector<16x128xf32>
    %93 = arith.mulf %91, %92 : vector<16x128xf32>
    %94 = vector.broadcast %73 : vector<1x128xf32> to vector<16x128xf32>
    %95 = arith.addf %93, %94 : vector<16x128xf32>
    %96 = arith.truncf %95 : vector<16x128xf32> to vector<16x128xbf16>
    %c0_43 = arith.constant 0 : index
    %c0_44 = arith.constant 0 : index
    %97 = vector.load %arg14[%c0_43, %c0_44] : memref<128x512xbf16, #tpu.memory_space<vmem>>, vector<128x512xbf16>
    %cst_45 = arith.constant dense<0.000000e+00> : vector<16x512xf32>
    %98 = tpu.matmul %96, %97, %cst_45 {dimension_numbers = #tpu.dot_dimension_numbers<[1], [0], [0], [1], [0, 0, 1, 1], [], []>} : vector<16x128xbf16>, vector<128x512xbf16>, vector<16x512xf32> -> vector<16x512xf32>
    %c0_46 = arith.constant 0 : index
    %c0_47 = arith.constant 0 : index
    %99 = vector.load %arg15[%c0_46, %c0_47] : memref<1x512xf32, #tpu.memory_space<vmem>>, vector<1x512xf32>
    %100 = vector.broadcast %99 : vector<1x512xf32> to vector<16x512xf32>
    %101 = arith.addf %98, %100 : vector<16x512xf32>
    %102 = arith.truncf %101 : vector<16x512xf32> to vector<16x512xbf16>
    %c0_48 = arith.constant 0 : index
    %c0_49 = arith.constant 0 : index
    %103 = vector.load %arg16[%c0_48, %c0_49] : memref<16x512xbf16, #tpu.memory_space<vmem>>, vector<16x512xbf16>
    tpu.vector_store %arg16[%c0_48, %c0_49], %102 {strides = array<i32>} : memref<16x512xbf16, #tpu.memory_space<vmem>>, vector<16x512xbf16>,
    return
  }
  func.func @transform_0(%arg0: i32) -> (i32, i32) {
    %c0_i32 = arith.constant 0 : i32
    %c0_i32_0 = arith.constant 0 : i32
    return %arg0, %c0_i32 : i32, i32
  }
  func.func @transform_1(%arg0: i32) -> (i32, i32) {
    %c0_i32 = arith.constant 0 : i32
    %c0_i32_0 = arith.constant 0 : i32
    %c0_i32_1 = arith.constant 0 : i32
    return %c0_i32, %c0_i32_0 : i32, i32
  }
  func.func @transform_2(%arg0: i32) -> (i32, i32) {
    %c0_i32 = arith.constant 0 : i32
    %c0_i32_0 = arith.constant 0 : i32
    %c0_i32_1 = arith.constant 0 : i32
    return %c0_i32, %c0_i32_0 : i32, i32
  }
  func.func @transform_3(%arg0: i32) -> (i32, i32) {
    %c0_i32 = arith.constant 0 : i32
    %c0_i32_0 = arith.constant 0 : i32
    %c0_i32_1 = arith.constant 0 : i32
    return %c0_i32, %c0_i32_0 : i32, i32
  }
  func.func @transform_4(%arg0: i32) -> (i32, i32) {
    %c0_i32 = arith.constant 0 : i32
    %c0_i32_0 = arith.constant 0 : i32
    %c0_i32_1 = arith.constant 0 : i32
    return %c0_i32, %c0_i32_0 : i32, i32
  }
  func.func @transform_5(%arg0: i32) -> (i32, i32) {
    %c0_i32 = arith.constant 0 : i32
    %c0_i32_0 = arith.constant 0 : i32
    %c0_i32_1 = arith.constant 0 : i32
    return %c0_i32, %c0_i32_0 : i32, i32
  }
  func.func @transform_6(%arg0: i32) -> (i32, i32) {
    %c0_i32 = arith.constant 0 : i32
    %c0_i32_0 = arith.constant 0 : i32
    %c0_i32_1 = arith.constant 0 : i32
    return %c0_i32, %c0_i32_0 : i32, i32
  }
  func.func @transform_7(%arg0: i32) -> (i32, i32) {
    %c0_i32 = arith.constant 0 : i32
    %c0_i32_0 = arith.constant 0 : i32
    %c0_i32_1 = arith.constant 0 : i32
    return %c0_i32, %c0_i32_0 : i32, i32
  }
  func.func @transform_8(%arg0: i32) -> (i32, i32) {
    %c0_i32 = arith.constant 0 : i32
    %c0_i32_0 = arith.constant 0 : i32
    %c0_i32_1 = arith.constant 0 : i32
    return %c0_i32, %c0_i32_0 : i32, i32
  }
  func.func @transform_9(%arg0: i32) -> (i32, i32) {
    %c0_i32 = arith.constant 0 : i32
    %c0_i32_0 = arith.constant 0 : i32
    %c0_i32_1 = arith.constant 0 : i32
    return %c0_i32, %c0_i32_0 : i32, i32
  }
  func.func @transform_10(%arg0: i32) -> (i32, i32) {
    %c0_i32 = arith.constant 0 : i32
    %c0_i32_0 = arith.constant 0 : i32
    %c0_i32_1 = arith.constant 0 : i32
    return %c0_i32, %c0_i32_0 : i32, i32
  }
  func.func @transform_11(%arg0: i32) -> (i32, i32) {
    %c0_i32 = arith.constant 0 : i32
    %c0_i32_0 = arith.constant 0 : i32
    %c0_i32_1 = arith.constant 0 : i32
    return %c0_i32, %c0_i32_0 : i32, i32
  }
  func.func @transform_12(%arg0: i32) -> (i32, i32) {
    %c0_i32 = arith.constant 0 : i32
    %c0_i32_0 = arith.constant 0 : i32
    %c0_i32_1 = arith.constant 0 : i32
    return %c0_i32, %c0_i32_0 : i32, i32
  }
  func.func @transform_13(%arg0: i32) -> (i32, i32) {
    %c0_i32 = arith.constant 0 : i32
    %c0_i32_0 = arith.constant 0 : i32
    %c0_i32_1 = arith.constant 0 : i32
    return %c0_i32, %c0_i32_0 : i32, i32
  }
  func.func @transform_14(%arg0: i32) -> (i32, i32) {
    %c0_i32 = arith.constant 0 : i32
    %c0_i32_0 = arith.constant 0 : i32
    %c0_i32_1 = arith.constant 0 : i32
    return %c0_i32, %c0_i32_0 : i32, i32
  }
  func.func @transform_15(%arg0: i32) -> (i32, i32) {
    %c0_i32 = arith.constant 0 : i32
    %c0_i32_0 = arith.constant 0 : i32
    return %arg0, %c0_i32 : i32, i32
  }
}

</mosaic_0001>

<bundles_post_ra>
// kernel: gpt_language_model_forward.1
= control target key start
LH: loop header
LB: loop body
LE: loop exit
PB: predicated region body
PF: predicated region fallthrough
CT: control target
= control target key end

     0   :  { %20 = vsyncpa [#allocation3], 0  ;;  %s2028_s0 = inlined_call_operand.vmem [shape: bf16[16,128], index: 0, kind: input, shape index: {}]   ;;  %s2029_s1 = inlined_call_operand.vmem [shape: f32[1,128], index: 1, kind: input, shape index: {}]   ;;  %s2030_s2 = inlined_call_operand.vmem [shape: f32[1,128], index: 2, kind: input, shape index: {}]   ;;  %s2031_s3 = inlined_call_operand.vmem [shape: bf16[128,128], index: 3, kind: input, shape index: {}]   ;;  %s2032_s4 = inlined_call_operand.vmem [shape: f32[1,128], index: 4, kind: input, shape index: {}]   ;;  %s2033_s5 = inlined_call_operand.vmem [shape: f32[1,128], index: 5, kind: input, shape index: {}]   ;;  %s2034_s6 = inlined_call_operand.vmem [shape: f32[1,128], index: 6, kind: input, shape index: {}]   ;;  %s2035_s7 = inlined_call_operand.hbm [shape: bf16[128,512], index: 7, kind: input, shape index: {}]   ;;  %s2036_s8 = inlined_call_operand.vmem [shape: f32[1,512], index: 8, kind: input, shape index: {}]   ;;  %s2037_s9 = inlined_call_operand.hbm [shape: bf16[512,128], index: 9, kind: input, shape index: {}]   ;;  %s2038_s10 = inlined_call_operand.vmem [shape: f32[1,128], index: 10, kind: input, shape index: {}]   ;;  %s2039_s11 = inlined_call_operand.vmem [shape: f32[1,128], index: 11, kind: input, shape index: {}]   ;;  %s2040_s12 = inlined_call_operand.vmem [shape: f32[1,128], index: 12, kind: input, shape index: {}]   ;;  %s2041_s13 = inlined_call_operand.hbm [shape: bf16[128,512], index: 13, kind: input, shape index: {}]   ;;  %s2042_s14 = inlined_call_operand.vmem [shape: f32[1,512], index: 14, kind: input, shape index: {}]   ;;  %s2043_s15 = inlined_call_operand.hbm [shape: bf16[16,512], index: 15, kind: output, shape index: {}]  }
   0x1   :  { %21 = vsyncpa [#allocation6], 0 }
   0x2   :  { %22 = vsyncpa [#allocation4], 0  ;;  %s1793_s18 = smov [#allocation5]  }
   0x3   :  { %s56_s19 = sshll.u32 %s1793_s18, 4  ;;  %s57_s19 = int_to_ptr.vmem [resolvable:$true] %s56_s19 }
   0x4   :  { %s1715_s20 = scalar_lea.vmem %s57_s19, 4096  ;;  %p1720_p1 = scmp.lt.s32.totalorder %s57_s19, %s57_s19 }
   0x5   :  { %p1716_p0 = scmp.ne.s32.totalorder %s57_s19, %s1715_s20  ;;  %p1721_p2 = scmp.lt.s32.totalorder %s1715_s20, %s1715_s20 }
   0x7   :  { %p1722_p3 = por %p1721_p2, %p1720_p1 }
   0x9   :  { %p1723_p4 = pnand %p1722_p3, %p1716_p0 }
   0xb   :  { %1726 = shalt.err (!%p1723_p4)
}
   0xc   :  { %s1794_s21 = smov 64   ;;  %s1795_s22 = smov 4  }
   0xd   :  { %62 = dma.hbm_to_vmem [thread:$0]  %s2037_s9, 4096, %s57_s19, [#allocation6], %s1794_s21, %s1794_s21, %s1795_s22  }
   0xe   :  { %s1796_s25 = smov [#allocation2]  }
   0xf   :  { %s42_s26 = sshll.u32 %s1796_s25, 4  ;;  %s43_s26 = int_to_ptr.vmem [resolvable:$true] %s42_s26 }
  0x10   :  { %s1735_s27 = scalar_lea.vmem %s43_s26, 4096  ;;  %p1740_p6 = scmp.lt.s32.totalorder %s43_s26, %s43_s26 }
  0x11   :  { %p1736_p5 = scmp.ne.s32.totalorder %s43_s26, %s1735_s27  ;;  %p1741_p7 = scmp.lt.s32.totalorder %s1735_s27, %s1735_s27 }
  0x13   :  { %p1742_p8 = por %p1741_p7, %p1740_p6 }
  0x15   :  { %p1743_p9 = pnand %p1742_p8, %p1736_p5 }
  0x17   :  { %1746 = shalt.err (!%p1743_p9)
}
  0x18   :  { %s1797_s28 = smov 256   ;;  %s1798_s29 = smov 16  }
  0x19   :  { %48 = dma.hbm_to_vmem [thread:$0]  %s2035_s7, 4096, %s43_s26, [#allocation3], %s1797_s28, %s1797_s28, %s1798_s29  }
  0x1a   :  { %s1799_s9 = smov [#allocation7]  }
  0x1b   :  { %s74_s17 = sshll.u32 %s1799_s9, 4  ;;  %s75_s17 = int_to_ptr.vmem [resolvable:$true] %s74_s17 }
  0x1c   :  { %s1755_s18 = scalar_lea.vmem %s75_s17, 4096  ;;  %p1760_p11 = scmp.lt.s32.totalorder %s75_s17, %s75_s17 }
  0x1d   :  { %p1756_p10 = scmp.ne.s32.totalorder %s75_s17, %s1755_s18  ;;  %p1761_p12 = scmp.lt.s32.totalorder %s1755_s18, %s1755_s18 }
  0x1f   :  { %p1762_p13 = por %p1761_p12, %p1760_p11 }
  0x21   :  { %p1763_p0 = pnand %p1762_p13, %p1756_p10 }
  0x23   :  { %1766 = shalt.err (!%p1763_p0)
}
  0x24   :  { %80 = dma.hbm_to_vmem [thread:$0]  %s2041_s13, 4096, %s75_s17, [#allocation6], %s1797_s28, %s1797_s28, %s1798_s29  }
  0x25   :  { %1787 = dma.done.wait [#allocation3], 4096  }
  0x26   :  { %1788 = vsyncadd [#allocation3], 4294963200 }
  0x27   :  { %1789 = dma.done.wait [#allocation6], 8192  }
  0x28   :  { %1790 = vsyncadd [#allocation6], 4294959104  ;;  %v1472_v0 = vld [vmem:[%s2028_s0] sm:$0xff]   ;;  %v1559_v5 = vld [vmem:[%s2031_s3 + $0x38] sm:$0xff]   ;;  %v1800_v6 = vmov 0.0   ;;  %vm1801_vm0 = vmmov 0  }
  0x29   :  { %v1902_v1 = vunpack.c.l.bf16 %v1472_v0  ;;  %v1904_v2 = vunpack.c.h.bf16 %v1472_v0  ;;  %1528 = vmatprep.subr.bf16.mxu0 %v1800_v6  ;;  %v1560_v7 = vld [vmem:[%s2031_s3 + $0x30] sm:$0xff]   ;;  %v1561_v8 = vld [vmem:[%s2031_s3 + $0x28] sm:$0xff]   ;;  %v1562_v9 = vld [vmem:[%s2031_s3 + $0x20] sm:$0xff]   ;;  %1544 = vmatprep.mubr.msk.bf16.mxu0 %vm1801_vm0, %v1800_v6 }
  0x2a   :  { %1529 = vmatpush3.bf16.msra.mxu0 %v1559_v5  ;;  %v1563_v10 = vld [vmem:[%s2031_s3 + $0x18] sm:$0xff]   ;;  %v1564_v11 = vld [vmem:[%s2031_s3 + $0x10] sm:$0xff]   ;;  %v1565_v12 = vld [vmem:[%s2031_s3 + $0x8] sm:$0xff]  }
  0x2b   :  { %99 = vadd.xlane.f32.xlu0 %v1902_v1  ;;  %v105_v3 = vmul.f32 %v1902_v1, %v1902_v1  ;;  %v106_v4 = vmul.f32 %v1904_v2, %v1904_v2  ;;  %1530 = vmatprep.subr.bf16.mxu0 %v1800_v6  ;;  %v1566_v13 = vld [vmem:[%s2031_s3] sm:$0xff]   ;;  %v1571_v53 = vld [vmem:[#allocation2 + $0xec] ss:$16 sps:$4 sm:$0xff]   ;;  %v1569_v54 = vld [vmem:[#allocation2 + $0xe8] ss:$16 sps:$4 sm:$0xff]  }
  0x2c   :  { %v1351_v31 = vld [vmem:[%s2029_s1] ss:$0 sm:$0xff]  ;;  %v1567_v52 = vld [vmem:[#allocation2 + $0xe4] ss:$16 sps:$4 sm:$0xff]   ;;  %v1577_v57 = vld [vmem:[#allocation2 + $0xcc] ss:$16 sps:$4 sm:$0xff]  }
  0x2d   :  { %107 = vadd.xlane.f32.xlu1 %v105_v3  ;;  %v1352_v36 = vld [vmem:[%s2030_s2] ss:$0 sm:$0xff]  ;;  %515 = vmatprep.subr.bf16.mxu1 %v1567_v52  ;;  %v1573_v56 = vld [vmem:[#allocation2 + $0xc4] ss:$16 sps:$4 sm:$0xff]   ;;  %v1575_v58 = vld [vmem:[#allocation2 + $0xc8] ss:$16 sps:$4 sm:$0xff]  }
  0x2e   :  { %1531 = vmatpush3.bf16.msra.mxu0 %v1560_v7  ;;  %v1353_v41 = vld [vmem:[%s2032_s4] ss:$0 sm:$0xff]  ;;  %v1579_v60 = vld [vmem:[#allocation2 + $0xa4] ss:$16 sps:$4 sm:$0xff]   ;;  %v1583_v61 = vld [vmem:[#allocation2 + $0xac] ss:$16 sps:$4 sm:$0xff]  }
  0x2f   :  { %101 = vadd.xlane.f32.xlu0 %v1904_v2  ;;  %1532 = vmatprep.subr.bf16.mxu0 %v1800_v6  ;;  %v1572_v55 = vld [vmem:[#allocation2 + $0xe0] ss:$16 sps:$4 sm:$0xff]   ;;  %v1581_v62 = vld [vmem:[#allocation2 + $0xa8] ss:$16 sps:$4 sm:$0xff]   ;;  %v1585_v0 = vld [vmem:[#allocation2 + $0x84] ss:$16 sps:$4 sm:$0xff]  }
  0x30   :  { %516 = vmatpush1.bf16.msra.mxu1 %v1572_v55  ;;  %v1578_v59 = vld [vmem:[#allocation2 + $0xc0] ss:$16 sps:$4 sm:$0xff]   ;;  %v1595_v5 = vld [vmem:[#allocation2 + $0x6c] ss:$16 sps:$4 sm:$0xff]  }
  0x31   :  { %109 = vadd.xlane.f32.xlu1 %v106_v4  ;;  %517 = vmatprep.subr.bf16.mxu1 %v1573_v56  ;;  %v1584_v63 = vld [vmem:[#allocation2 + $0xa0] ss:$16 sps:$4 sm:$0xff]   ;;  %v1591_v4 = vld [vmem:[#allocation2 + $0x64] ss:$16 sps:$4 sm:$0xff]   ;;  %v1618_v52 = vld [vmem:[#allocation5 + $0xb8] sm:$0xff]  }
  0x32   :  { %1533 = vmatpush3.bf16.msra.mxu0 %v1561_v8  ;;  %v1590_v3 = vld [vmem:[#allocation2 + $0x80] ss:$16 sps:$4 sm:$0xff]   ;;  %v1597_v8 = vld [vmem:[#allocation2 + $0x44] ss:$16 sps:$4 sm:$0xff]  }
  0x33   :  { %1534 = vmatprep.subr.bf16.mxu0 %v1800_v6  ;;  %v1596_v7 = vld [vmem:[#allocation2 + $0x60] ss:$16 sps:$4 sm:$0xff]  }
  0x34   :  { %518 = vmatpush1.bf16.msra.mxu1 %v1578_v59  ;;  %v1620_v55 = vld [vmem:[#allocation5 + $0xf0] sm:$0xff]   ;;  %v1624_v59 = vld [vmem:[#allocation5 + $0xe8] sm:$0xff]  }
  0x35   :  { %519 = vmatprep.subr.bf16.mxu1 %v1579_v60  ;;  %v1621_v56 = vld [vmem:[#allocation5 + $0x30] sm:$0xff]   ;;  %v1625_v60 = vld [vmem:[#allocation5 + $0x28] sm:$0xff]  }
  0x36   :  { %1535 = vmatpush3.bf16.msra.mxu0 %v1562_v9  ;;  %v1601_v9 = vld [vmem:[#allocation2 + $0x4c] ss:$16 sps:$4 sm:$0xff]  }
  0x37   :  { %1536 = vmatprep.subr.bf16.mxu0 %v1800_v6 }
  0x38   :  { %520 = vmatpush1.bf16.msra.mxu1 %v1584_v63  ;;  %v1628_v63 = vld [vmem:[#allocation5 + $0xe0] sm:$0xff]  }
  0x39   :  { %521 = vmatprep.subr.bf16.mxu1 %v1585_v0  ;;  %v1629_v0 = vld [vmem:[#allocation5 + $0x20] sm:$0xff]  }
  0x3a   :  { %1537 = vmatpush3.bf16.msra.mxu0 %v1563_v10  ;;  %v1599_v10 = vld [vmem:[#allocation2 + $0x48] ss:$16 sps:$4 sm:$0xff]  }
  0x3b   :  { %1538 = vmatprep.subr.bf16.mxu0 %v1800_v6 }
  0x3c   :  { %522 = vmatpush1.bf16.msra.mxu1 %v1590_v3  ;;  %v1632_v3 = vld [vmem:[#allocation5 + $0xd8] sm:$0xff]  }
  0x3d   :  { %523 = vmatprep.subr.bf16.mxu1 %v1591_v4  ;;  %v1633_v4 = vld [vmem:[#allocation5 + $0x18] sm:$0xff]  }
  0x3e   :  { %1539 = vmatpush3.bf16.msra.mxu0 %v1564_v11  ;;  %v1602_v11 = vld [vmem:[#allocation2 + $0x40] ss:$16 sps:$4 sm:$0xff]  }
  0x3f   :  { %1540 = vmatprep.subr.bf16.mxu0 %v1800_v6 }
  0x40   :  { %524 = vmatpush1.bf16.msra.mxu1 %v1596_v7  ;;  %v1636_v7 = vld [vmem:[#allocation5 + $0xd0] sm:$0xff]  }
  0x41   :  { %525 = vmatprep.subr.bf16.mxu1 %v1597_v8  ;;  %v1637_v8 = vld [vmem:[#allocation5 + $0x10] sm:$0xff]  }
  0x42   :  { %1541 = vmatpush3.bf16.msra.mxu0 %v1565_v12  ;;  %v1603_v12 = vld [vmem:[#allocation2 + $0x24] ss:$16 sps:$4 sm:$0xff]  }
  0x43   :  { %1542 = vmatprep.subr.bf16.mxu0 %v1800_v6  ;;  %v1593_v6 = vld [vmem:[#allocation2 + $0x68] ss:$16 sps:$4 sm:$0xff]  }
  0x44   :  { %526 = vmatpush1.bf16.msra.mxu1 %v1602_v11  ;;  %v1640_v11 = vld [vmem:[#allocation5 + $0xc8] sm:$0xff]  }
  0x45   :  { %527 = vmatprep.subr.bf16.mxu1 %v1603_v12  ;;  %v1641_v12 = vld [vmem:[#allocation5 + $0x8] sm:$0xff]  }
  0x46   :  { %1543 = vmatpush3.bf16.msra.mxu0 %v1566_v13  ;;  %v1607_v13 = vld [vmem:[#allocation2 + $0x2c] ss:$16 sps:$4 sm:$0xff]  }
  0x47   :  { %558 = vmatprep.subr.bf16.mxu0 %v1571_v53 }
  0xb4   :  { %v100_v14 = vpop.xlane.xlu0 %99 }
  0xb5   :  { %v103_v15 = vmul.f32 0.008928572, %v100_v14  ;;  %v1802_v14 = vmov 0  }
  0xb6   :  { %v108_v16 = vpop.xlane.xlu1 %107  ;;  %547 = vmatprep.mubr.bf16.mxu1 %v1802_v14 }
  0xb7   :  { %v113_v17 = vmul.f32 %v103_v15, %v103_v15  ;;  %v111_v18 = vmul.f32 0.008928572, %v108_v16  ;;  %v117_v28 = vsub.f32 %v1902_v1, %v103_v15  ;;  %v1605_v15 = vld [vmem:[#allocation2 + $0x28] ss:$16 sps:$4 sm:$0xff]   ;;  %v1608_v16 = vld [vmem:[#allocation2 + $0x20] ss:$16 sps:$4 sm:$0xff]  }
  0xb8   :  { %v102_v19 = vpop.xlane.xlu0 %101  ;;  %528 = vmatpush1.bf16.msra.mxu1 %v1608_v16  ;;  %v1644_v16 = vld [vmem:[#allocation5 + $0xc0] sm:$0xff]  }
  0xb9   :  { %v115_v20 = vsub.f32 %v111_v18, %v113_v17  ;;  %v104_v21 = vmul.f32 0.008928572, %v102_v19  ;;  %v1609_v17 = vld [vmem:[#allocation2 + $0x4] ss:$16 sps:$4 sm:$0xff]   ;;  %v1613_v18 = vld [vmem:[#allocation2 + $0xc] ss:$16 sps:$4 sm:$0xff]  }
  0xba   :  { %v110_v22 = vpop.xlane.xlu1 %109  ;;  %v1611_v19 = vld [vmem:[#allocation2 + $0x8] ss:$16 sps:$4 sm:$0xff]   ;;  %529 = vmatprep.subr.bf16.mxu1 %v1609_v17  ;;  %v1645_v17 = vld [vmem:[#allocation5] sm:$0xff]  }
  0xbb   :  { %v119_v23 = vadd.f32 1e-05, %v115_v20  ;;  %v114_v24 = vmul.f32 %v104_v21, %v104_v21  ;;  %v112_v25 = vmul.f32 0.008928572, %v110_v22  ;;  %v118_v32 = vsub.f32 %v1904_v2, %v104_v21  ;;  %v1614_v20 = vld [vmem:[#allocation2] ss:$16 sps:$4 sm:$0xff]  }
  0xbc   :  { %530 = vmatpush1.bf16.msra.mxu1 %v1614_v20  ;;  %v1615_v21 = vld [vmem:[#allocation5 + $0x78] sm:$0xff]  }
  0xbd   :  { %1695 = vrsqrt.f32 %v119_v23  ;;  %v116_v26 = vsub.f32 %v112_v25, %v114_v24  ;;  %v1616_v22 = vld [vmem:[#allocation5 + $0xf8] sm:$0xff]   ;;  %1484 = vmatprep.subr.bf16.mxu1 %v1615_v21 }
  0xbf   :  { %v120_v27 = vadd.f32 1e-05, %v116_v26 }
  0xc1   :  { %1697 = vrsqrt.f32 %v120_v27 }
  0xca   :  { %v1696_v29 = vpop.eup %1695 }
  0xcb   :  { %v123_v30 = vmul.f32 %v1696_v29, %v117_v28 }
  0xcd   :  { %v131_v35 = vmul.f32 %v1351_v31, %v123_v30 }
  0xce   :  { %v1698_v33 = vpop.eup %1697 }
  0xcf   :  { %v124_v34 = vmul.f32 %v1698_v33, %v118_v32  ;;  %v139_v38 = vadd.f32 %v1352_v36, %v131_v35 }
  0xd1   :  { %v132_v37 = vmul.f32 %v1351_v31, %v124_v34 }
  0xd3   :  { %v140_v39 = vadd.f32 %v1352_v36, %v132_v37 }
  0xd5   :  { %v141_v40 = vpack.c.bf16 %v140_v39, %v139_v38 }
  0xd7   :  { %1545 = vmatmul.mubr.bf16.vlgmr.msra.gmra.mxu0 %v141_v40  ;;  %v1362_v40 = vld [vmem:[%s2033_s5] ss:$0 sm:$0xff] }
  0xd8   :  { %559 = vmatpush1.bf16.msra.mxu0 %v1569_v54  ;;  %590 = vmatprep.mubr.bf16.mxu0 %v1802_v14  ;;  %v1619_v54 = vld [vmem:[#allocation5 + $0x70] sm:$0xff]  }
  0xd9   :  { %560 = vmatprep.subr.bf16.mxu0 %v1577_v57  ;;  %v1622_v57 = vld [vmem:[#allocation5 + $0xb0] sm:$0xff]  }
  0xdc   :  { %561 = vmatpush1.bf16.msra.mxu0 %v1575_v58  ;;  %v1623_v58 = vld [vmem:[#allocation5 + $0x68] sm:$0xff]  }
  0xdd   :  { %562 = vmatprep.subr.bf16.mxu0 %v1583_v61  ;;  %v1626_v61 = vld [vmem:[#allocation5 + $0xa8] sm:$0xff]  }
  0xe0   :  { %563 = vmatpush1.bf16.msra.mxu0 %v1581_v62  ;;  %v1627_v62 = vld [vmem:[#allocation5 + $0x60] sm:$0xff]  }
 0x197   :  { %v247_v42 = vpop.f32.mrf.mxu0 }
 0x198   :  { %v248_v43 = vadd.f32 %v1353_v41, %v247_v42 }
 0x199   :  { %v1546_v44 = vpop.f32.mrf.mxu0 }
 0x19a   :  { %v1948_v45 = vadd.f32 %v1902_v1, %v248_v43  ;;  %v1587_v1 = vld [vmem:[#allocation2 + $0x88] ss:$16 sps:$4 sm:$0xff]  }
 0x19b   :  { %v250_v46 = vpop.f32.mrf.mxu0 }
 0x19c   :  { %v251_v47 = vadd.f32 %v1353_v41, %v250_v46  ;;  %258 = vadd.xlane.f32.xlu0 %v1948_v45  ;;  %v264_v50 = vmul.f32 %v1948_v45, %v1948_v45  ;;  %v1363_v46 = vld [vmem:[%s2034_s6] ss:$0 sm:$0xff] }
 0x19d   :  { %v1547_v48 = vpop.f32.mrf.mxu0 }
 0x19e   :  { %v1952_v49 = vadd.f32 %v1904_v2, %v251_v47  ;;  %v1589_v2 = vld [vmem:[#allocation2 + $0x8c] ss:$16 sps:$4 sm:$0xff]  }
 0x19f   :  { %564 = vmatprep.subr.bf16.mxu0 %v1589_v2  ;;  %v1631_v2 = vld [vmem:[#allocation5 + $0x58] sm:$0xff]  }
 0x1a0   :  { %266 = vadd.xlane.f32.xlu0 %v264_v50  ;;  %260 = vadd.xlane.f32.xlu1 %v1952_v49  ;;  %v265_v51 = vmul.f32 %v1952_v49, %v1952_v49 }
 0x1a1   :  { %565 = vmatpush1.bf16.msra.mxu0 %v1587_v1  ;;  %v1630_v1 = vld [vmem:[#allocation5 + $0xa0] sm:$0xff]  }
 0x1a2   :  { %566 = vmatprep.subr.bf16.mxu0 %v1595_v5  ;;  %v1634_v5 = vld [vmem:[#allocation5 + $0x98] sm:$0xff]  }
 0x1a4   :  { %268 = vadd.xlane.f32.xlu1 %v265_v51  ;;  %v1617_v51 = vld [vmem:[#allocation5 + $0x38] sm:$0xff]  }
 0x1a5   :  { %567 = vmatpush1.bf16.msra.mxu0 %v1593_v6  ;;  %v1635_v6 = vld [vmem:[#allocation5 + $0x50] sm:$0xff]  }
 0x1a6   :  { %568 = vmatprep.subr.bf16.mxu0 %v1601_v9  ;;  %v1638_v9 = vld [vmem:[#allocation5 + $0x90] sm:$0xff]  }
 0x1a9   :  { %569 = vmatpush1.bf16.msra.mxu0 %v1599_v10  ;;  %v1639_v10 = vld [vmem:[#allocation5 + $0x48] sm:$0xff]  }
 0x1aa   :  { %570 = vmatprep.subr.bf16.mxu0 %v1607_v13  ;;  %v1642_v13 = vld [vmem:[#allocation5 + $0x88] sm:$0xff]  }
 0x1ad   :  { %571 = vmatpush1.bf16.msra.mxu0 %v1605_v15  ;;  %v1643_v15 = vld [vmem:[#allocation5 + $0x40] sm:$0xff]  }
 0x1ae   :  { %572 = vmatprep.subr.bf16.mxu0 %v1613_v18  ;;  %v1646_v18 = vld [vmem:[#allocation5 + $0x80] sm:$0xff]  }
 0x1b1   :  { %573 = vmatpush1.bf16.msra.mxu0 %v1611_v19  ;;  %v335_v19 = vlaneseq }
 0x1b2   :  { %1506 = vmatprep.subr.bf16.mxu0 %v1616_v22 }
 0x1b3   :  { %v1969_v20 = vshrl.u32 %v335_v19, 7  ;;  %v1650_v19 = vld [vmem:[#allocation7 + $0xe8] ss:$16 sps:$4 sm:$0xff]  }
 0x1b5   :  { %v341_v21 = vsub.s32 1, %v1969_v20  ;;  %v349_v22 = vsub.s32 3, %v1969_v20 }
 0x225   :  { %v259_v23 = vpop.xlane.xlu0 %258 }
 0x226   :  { %v262_v24 = vmul.f32 0.008928572, %v259_v23  ;;  %v337_v23 = vsub.s32 0, %v1969_v20 }
 0x228   :  { %v272_v27 = vmul.f32 %v262_v24, %v262_v24  ;;  %v276_v37 = vsub.f32 %v1948_v45, %v262_v24  ;;  %v345_v24 = vsub.s32 2, %v1969_v20 }
 0x229   :  { %v267_v25 = vpop.xlane.xlu0 %266  ;;  %v261_v26 = vpop.xlane.xlu1 %260 }
 0x22a   :  { %v270_v28 = vmul.f32 0.008928572, %v267_v25  ;;  %v263_v29 = vmul.f32 0.008928572, %v261_v26  ;;  %v333_v25 = vld [vmem:[%s2036_s8] sm:$0xf] }
 0x22c   :  { %v274_v30 = vsub.f32 %v270_v28, %v272_v27  ;;  %v273_v33 = vmul.f32 %v263_v29, %v263_v29  ;;  %v277_v41 = vsub.f32 %v1952_v49, %v263_v29  ;;  %v342_v28 = vrot.slane %v333_v25, %v341_v21 }
 0x22d   :  { %v269_v31 = vpop.xlane.xlu1 %268  ;;  %v350_v29 = vrot.slane %v333_v25, %v349_v22 }
 0x22e   :  { %v278_v32 = vadd.f32 1e-05, %v274_v30  ;;  %v271_v34 = vmul.f32 0.008928572, %v269_v31  ;;  %v338_v30 = vrot.slane %v333_v25, %v337_v23  ;;  %v346_v31 = vrot.slane %v333_v25, %v345_v24  ;;  %v1658_v25 = vld [vmem:[#allocation7 + $0xcc] ss:$16 sps:$4 sm:$0xff]  }
 0x230   :  { %1699 = vrsqrt.f32 %v278_v32  ;;  %v275_v35 = vsub.f32 %v271_v34, %v273_v33 }
 0x232   :  { %v279_v36 = vadd.f32 1e-05, %v275_v35 }
 0x234   :  { %1701 = vrsqrt.f32 %v279_v36 }
 0x23d   :  { %v1700_v38 = vpop.eup %1699 }
 0x23e   :  { %v282_v39 = vmul.f32 %v1700_v38, %v276_v37 }
 0x240   :  { %v290_v44 = vmul.f32 %v1362_v40, %v282_v39 }
 0x241   :  { %v1702_v42 = vpop.eup %1701 }
 0x242   :  { %v283_v43 = vmul.f32 %v1702_v42, %v277_v41  ;;  %v298_v48 = vadd.f32 %v1363_v46, %v290_v44 }
 0x244   :  { %v291_v47 = vmul.f32 %v1362_v40, %v283_v43 }
 0x246   :  { %v299_v50 = vadd.f32 %v1363_v46, %v291_v47 }
 0x248   :  { %v300_v53 = vpack.c.bf16 %v299_v50, %v298_v48 }
 0x24a   :  { %548 = vmatmul.mubr.bf16.vlgmr.msra.gmra.mxu1 %v300_v53  ;;  %591 = vmatmul.mubr.bf16.vlgmr.msra.gmra.mxu0 %v300_v53 }
 0x24b   :  { %1485 = vmatpush3.bf16.msra.mxu1 %v1617_v51  ;;  %1507 = vmatpush3.bf16.msra.mxu0 %v1618_v52 }
 0x24c   :  { %1486 = vmatprep.subr.bf16.mxu1 %v1619_v54  ;;  %1508 = vmatprep.subr.bf16.mxu0 %v1620_v55 }
 0x24f   :  { %1487 = vmatpush3.bf16.msra.mxu1 %v1621_v56  ;;  %1509 = vmatpush3.bf16.msra.mxu0 %v1622_v57 }
 0x250   :  { %1488 = vmatprep.subr.bf16.mxu1 %v1623_v58  ;;  %1510 = vmatprep.subr.bf16.mxu0 %v1624_v59 }
 0x253   :  { %1489 = vmatpush3.bf16.msra.mxu1 %v1625_v60  ;;  %1511 = vmatpush3.bf16.msra.mxu0 %v1626_v61 }
 0x254   :  { %1490 = vmatprep.subr.bf16.mxu1 %v1627_v62  ;;  %1512 = vmatprep.subr.bf16.mxu0 %v1628_v63  ;;  %v1396_v62 = vld [vmem:[%s2038_s10] ss:$0 sm:$0xff] }
 0x257   :  { %1491 = vmatpush3.bf16.msra.mxu1 %v1629_v0  ;;  %1513 = vmatpush3.bf16.msra.mxu0 %v1630_v1 }
 0x258   :  { %1492 = vmatprep.subr.bf16.mxu1 %v1631_v2  ;;  %1514 = vmatprep.subr.bf16.mxu0 %v1632_v3 }
 0x25b   :  { %1493 = vmatpush3.bf16.msra.mxu1 %v1633_v4  ;;  %1515 = vmatpush3.bf16.msra.mxu0 %v1634_v5 }
 0x25c   :  { %1494 = vmatprep.subr.bf16.mxu1 %v1635_v6  ;;  %1516 = vmatprep.subr.bf16.mxu0 %v1636_v7 }
 0x25f   :  { %1495 = vmatpush3.bf16.msra.mxu1 %v1637_v8  ;;  %1517 = vmatpush3.bf16.msra.mxu0 %v1638_v9 }
 0x260   :  { %1496 = vmatprep.subr.bf16.mxu1 %v1639_v10  ;;  %1518 = vmatprep.subr.bf16.mxu0 %v1640_v11 }
 0x263   :  { %1497 = vmatpush3.bf16.msra.mxu1 %v1641_v12  ;;  %1519 = vmatpush3.bf16.msra.mxu0 %v1642_v13 }
 0x264   :  { %1498 = vmatprep.subr.bf16.mxu1 %v1643_v15  ;;  %1520 = vmatprep.subr.bf16.mxu0 %v1644_v16 }
 0x267   :  { %1499 = vmatpush3.bf16.msra.mxu1 %v1645_v17  ;;  %1521 = vmatpush3.bf16.msra.mxu0 %v1646_v18  ;;  %v1649_v17 = vld [vmem:[#allocation7 + $0xe4] ss:$16 sps:$4 sm:$0xff]   ;;  %v1652_v18 = vld [vmem:[#allocation7 + $0xec] ss:$16 sps:$4 sm:$0xff]  }
 0x268   :  { %1219 = vmatprep.subr.bf16.mxu1 %v1649_v17  ;;  %1262 = vmatprep.subr.bf16.mxu0 %v1652_v18 }
 0x30a   :  { %v549_v26 = vpop.f32.mrf.mxu1  ;;  %v592_v27 = vpop.f32.mrf.mxu0 }
 0x30b   :  { %v550_v40 = vadd.f32 %v549_v26, %v338_v30  ;;  %v593_v41 = vadd.f32 %v592_v27, %v346_v31  ;;  %v1653_v26 = vld [vmem:[#allocation7 + $0xc0] ss:$16 sps:$4 sm:$0xff]   ;;  %v1656_v27 = vld [vmem:[#allocation7 + $0xc8] ss:$16 sps:$4 sm:$0xff]  }
 0x30c   :  { %v551_v32 = vpop.f32.mrf.mxu1  ;;  %v594_v33 = vpop.f32.mrf.mxu0 }
 0x30d   :  { %v552_v36 = vadd.f32 %v551_v32, %v342_v28  ;;  %v595_v37 = vadd.f32 %v594_v33, %v350_v29  ;;  %v601_v54 = vmax.f32 %v550_v40, 0.0  ;;  %v603_v55 = vmax.f32 %v593_v41, 0.0  ;;  %v1665_v32 = vld [vmem:[#allocation7 + $0x80] ss:$16 sps:$4 sm:$0xff]   ;;  %v1667_v33 = vld [vmem:[#allocation7 + $0x84] ss:$16 sps:$4 sm:$0xff]  }
 0x30e   :  { %v553_v34 = vpop.f32.mrf.mxu1  ;;  %v596_v35 = vpop.f32.mrf.mxu0  ;;  %v1679_v40 = vld [vmem:[#allocation7 + $0x44] ss:$16 sps:$4 sm:$0xff]   ;;  %v1682_v41 = vld [vmem:[#allocation7 + $0x4c] ss:$16 sps:$4 sm:$0xff]  }
 0x30f   :  { %v554_v38 = vadd.f32 %v553_v34, %v338_v30  ;;  %v597_v39 = vadd.f32 %v596_v35, %v346_v31  ;;  %v602_v50 = vmax.f32 %v552_v36, 0.0  ;;  %v604_v51 = vmax.f32 %v595_v37, 0.0  ;;  %v1659_v30 = vld [vmem:[#allocation7 + $0xa0] ss:$16 sps:$4 sm:$0xff]   ;;  %v1662_v31 = vld [vmem:[#allocation7 + $0xa8] ss:$16 sps:$4 sm:$0xff]  }
 0x310   :  { %v555_v42 = vpop.f32.mrf.mxu1  ;;  %v598_v43 = vpop.f32.mrf.mxu0  ;;  %v1668_v34 = vld [vmem:[#allocation7 + $0x88] ss:$16 sps:$4 sm:$0xff]   ;;  %v1670_v35 = vld [vmem:[#allocation7 + $0x8c] ss:$16 sps:$4 sm:$0xff]   ;;  %v1673_v36 = vld [vmem:[#allocation7 + $0x64] ss:$16 sps:$4 sm:$0xff]  }
 0x311   :  { %v556_v44 = vadd.f32 %v555_v42, %v342_v28  ;;  %v599_v46 = vadd.f32 %v598_v43, %v350_v29  ;;  %v605_v47 = vmax.f32 %v554_v38, 0.0  ;;  %v607_v48 = vmax.f32 %v597_v39, 0.0  ;;  %v1661_v28 = vld [vmem:[#allocation7 + $0xa4] ss:$16 sps:$4 sm:$0xff]   ;;  %v1664_v29 = vld [vmem:[#allocation7 + $0xac] ss:$16 sps:$4 sm:$0xff]  }
 0x312   :  { %v1676_v37 = vld [vmem:[#allocation7 + $0x6c] ss:$16 sps:$4 sm:$0xff]   ;;  %v1671_v38 = vld [vmem:[#allocation7 + $0x60] ss:$16 sps:$4 sm:$0xff]   ;;  %v1674_v39 = vld [vmem:[#allocation7 + $0x68] ss:$16 sps:$4 sm:$0xff]  }
 0x313   :  { %v606_v52 = vmax.f32 %v556_v44, 0.0  ;;  %v608_v53 = vmax.f32 %v599_v46, 0.0  ;;  %v609_v58 = vpack.c.bf16 %v605_v47, %v601_v54  ;;  %v611_v59 = vpack.c.bf16 %v607_v48, %v603_v55  ;;  %v1677_v42 = vld [vmem:[#allocation7 + $0x40] ss:$16 sps:$4 sm:$0xff]   ;;  %v1680_v43 = vld [vmem:[#allocation7 + $0x48] ss:$16 sps:$4 sm:$0xff]  }
 0x314   :  { %v1685_v44 = vld [vmem:[#allocation7 + $0x24] ss:$16 sps:$4 sm:$0xff]   ;;  %v1688_v46 = vld [vmem:[#allocation7 + $0x2c] ss:$16 sps:$4 sm:$0xff]   ;;  %v1683_v47 = vld [vmem:[#allocation7 + $0x20] ss:$16 sps:$4 sm:$0xff]  }
 0x315   :  { %v610_v56 = vpack.c.bf16 %v606_v52, %v602_v50  ;;  %v612_v57 = vpack.c.bf16 %v608_v53, %v604_v51  ;;  %v1686_v48 = vld [vmem:[#allocation7 + $0x28] ss:$16 sps:$4 sm:$0xff]   ;;  %v1691_v50 = vld [vmem:[#allocation7 + $0x4] ss:$16 sps:$4 sm:$0xff]   ;;  %v1694_v51 = vld [vmem:[#allocation7 + $0xc] ss:$16 sps:$4 sm:$0xff]  }
 0x316   :  { %v1689_v52 = vld [vmem:[#allocation7] ss:$16 sps:$4 sm:$0xff]   ;;  %v1692_v53 = vld [vmem:[#allocation7 + $0x8] ss:$16 sps:$4 sm:$0xff]  }
 0x317   :  { %908 = vmatprep.mubr.bf16.mxu1 %v610_v56  ;;  %949 = vmatprep.mubr.bf16.mxu0 %v612_v57 }
 0x318   :  { %909 = vmatmul.mubr.bf16.vlgmr.msra.gmra.mxu1 %v609_v58  ;;  %950 = vmatmul.mubr.bf16.vlgmr.msra.gmra.mxu0 %v611_v59 }
 0x319   :  { %1251 = vmatprep.mubr.bf16.mxu1 %v1802_v14  ;;  %1294 = vmatprep.mubr.bf16.mxu0 %v1802_v14 }
 0x31a   :  { %1263 = vmatpush1.bf16.msra.mxu0 %v1650_v19 }
 0x31b   :  { %1264 = vmatprep.subr.bf16.mxu0 %v1658_v25 }
 0x31e   :  { %1265 = vmatpush1.bf16.msra.mxu0 %v1656_v27 }
 0x31f   :  { %1266 = vmatprep.subr.bf16.mxu0 %v1664_v29 }
 0x322   :  { %1267 = vmatpush1.bf16.msra.mxu0 %v1662_v31 }
 0x323   :  { %1268 = vmatprep.subr.bf16.mxu0 %v1670_v35 }
 0x326   :  { %1269 = vmatpush1.bf16.msra.mxu0 %v1668_v34 }
 0x327   :  { %1270 = vmatprep.subr.bf16.mxu0 %v1676_v37 }
 0x32a   :  { %1271 = vmatpush1.bf16.msra.mxu0 %v1674_v39 }
 0x32b   :  { %1272 = vmatprep.subr.bf16.mxu0 %v1682_v41 }
 0x32e   :  { %1273 = vmatpush1.bf16.msra.mxu0 %v1680_v43 }
 0x32f   :  { %1274 = vmatprep.subr.bf16.mxu0 %v1688_v46 }
 0x332   :  { %1275 = vmatpush1.bf16.msra.mxu0 %v1686_v48 }
 0x333   :  { %1276 = vmatprep.subr.bf16.mxu0 %v1694_v51 }
 0x336   :  { %1277 = vmatpush1.bf16.msra.mxu0 %v1692_v53 }
 0x3d8   :  { %v1500_v60 = vpop.f32.mrf.mxu1  ;;  %v1522_v61 = vpop.f32.mrf.mxu0 }
 0x3da   :  { %v1501_v63 = vpop.f32.mrf.mxu1  ;;  %v1523_v0 = vpop.f32.mrf.mxu0 }
 0x3db   :  { %v1502_v1 = vadd.f32 %v1501_v63, %v1500_v60  ;;  %v1524_v5 = vadd.f32 %v1523_v0, %v1522_v61 }
 0x3dc   :  { %v1503_v2 = vpop.f32.mrf.mxu1  ;;  %v1525_v3 = vpop.f32.mrf.mxu0 }
 0x3dd   :  { %v911_v4 = vadd.f32 %v1502_v1, %v1396_v62 }
 0x3de   :  { %v1504_v6 = vpop.f32.mrf.mxu1  ;;  %v1526_v7 = vpop.f32.mrf.mxu0 }
 0x3df   :  { %v952_v8 = vadd.f32 %v1524_v5, %v911_v4  ;;  %v1505_v9 = vadd.f32 %v1504_v6, %v1503_v2  ;;  %v1527_v11 = vadd.f32 %v1526_v7, %v1525_v3  ;;  %v1429_v7 = vld [vmem:[%s2039_s11] ss:$0 sm:$0xff]  ;;  %s1803_s11 = smov [#allocation8]  }
 0x3e1   :  { %v914_v10 = vadd.f32 %v1505_v9, %v1396_v62  ;;  %v1992_v14 = vadd.f32 %v952_v8, %v1948_v45  ;;  %v1647_v45 = vld [vmem:[#allocation7 + $0xe0] ss:$16 sps:$4 sm:$0xff]  }
 0x3e2   :  { %1220 = vmatpush1.bf16.msra.mxu1 %v1647_v45 }
 0x3e3   :  { %v955_v12 = vadd.f32 %v1527_v11, %v914_v10  ;;  %962 = vadd.xlane.f32.xlu0 %v1992_v14  ;;  %v968_v15 = vmul.f32 %v1992_v14, %v1992_v14 }
 0x3e5   :  { %v1996_v13 = vadd.f32 %v955_v12, %v1952_v49  ;;  %v1655_v49 = vld [vmem:[#allocation7 + $0xc4] ss:$16 sps:$4 sm:$0xff]   ;;  %v1430_v12 = vld [vmem:[%s2040_s12] ss:$0 sm:$0xff]  ;;  %s1338_s12 = sshll.u32 %s1803_s11, 4  ;;  %s1339_s12 = int_to_ptr.vmem [resolvable:$true] %s1338_s12 }
 0x3e6   :  { %1221 = vmatprep.subr.bf16.mxu1 %v1655_v49  ;;  %p1772_p2 = scmp.lt.s32.totalorder %s1339_s12, %s1339_s12 }
 0x3e7   :  { %964 = vadd.xlane.f32.xlu1 %v1996_v13  ;;  %970 = vadd.xlane.f32.xlu0 %v968_v15  ;;  %v969_v16 = vmul.f32 %v1996_v13, %v1996_v13 }
 0x3e8   :  { %1222 = vmatpush1.bf16.msra.mxu1 %v1653_v26 }
 0x3e9   :  { %1223 = vmatprep.subr.bf16.mxu1 %v1661_v28 }
 0x3eb   :  { %972 = vadd.xlane.f32.xlu1 %v969_v16 }
 0x3ec   :  { %1224 = vmatpush1.bf16.msra.mxu1 %v1659_v30 }
 0x3ed   :  { %1225 = vmatprep.subr.bf16.mxu1 %v1667_v33 }
 0x3f0   :  { %1226 = vmatpush1.bf16.msra.mxu1 %v1665_v32 }
 0x3f1   :  { %1227 = vmatprep.subr.bf16.mxu1 %v1673_v36 }
 0x3f4   :  { %1228 = vmatpush1.bf16.msra.mxu1 %v1671_v38 }
 0x3f5   :  { %1229 = vmatprep.subr.bf16.mxu1 %v1679_v40 }
 0x3f8   :  { %1230 = vmatpush1.bf16.msra.mxu1 %v1677_v42 }
 0x3f9   :  { %1231 = vmatprep.subr.bf16.mxu1 %v1685_v44 }
 0x3fc   :  { %1232 = vmatpush1.bf16.msra.mxu1 %v1683_v47 }
 0x3fd   :  { %1233 = vmatprep.subr.bf16.mxu1 %v1691_v50 }
 0x400   :  { %1234 = vmatpush1.bf16.msra.mxu1 %v1689_v52 }
 0x46c   :  { %v963_v54 = vpop.xlane.xlu0 %962 }
 0x46d   :  { %v966_v55 = vmul.f32 0.008928572, %v963_v54 }
 0x46f   :  { %v976_v58 = vmul.f32 %v966_v55, %v966_v55  ;;  %v980_v4 = vsub.f32 %v1992_v14, %v966_v55  ;;  %v1037_v14 = vld [vmem:[%s2042_s14] sm:$0xf]  ;;  %s1767_s14 = scalar_lea.vmem %s1339_s12, 512 }
 0x470   :  { %v965_v56 = vpop.xlane.xlu1 %964  ;;  %v971_v57 = vpop.xlane.xlu0 %970  ;;  %v1050_v45 = vrot.slane %v1037_v14, %v345_v24  ;;  %v1046_v19 = vrot.slane %v1037_v14, %v341_v21  ;;  %v1054_v49 = vrot.slane %v1037_v14, %v349_v22  ;;  %p1768_p1 = scmp.ne.s32.totalorder %s1339_s12, %s1767_s14  ;;  %p1773_p3 = scmp.lt.s32.totalorder %s1767_s14, %s1767_s14 }
 0x471   :  { %v967_v59 = vmul.f32 0.008928572, %v965_v56  ;;  %v974_v60 = vmul.f32 0.008928572, %v971_v57 }
 0x472   :  { %p1774_p4 = por %p1773_p3, %p1772_p2 }
 0x473   :  { %v978_v61 = vsub.f32 %v974_v60, %v976_v58  ;;  %v977_v63 = vmul.f32 %v967_v59, %v967_v59  ;;  %v981_v8 = vsub.f32 %v1996_v13, %v967_v59  ;;  %v1042_v13 = vrot.slane %v1037_v14, %v337_v23 }
 0x474   :  { %v973_v62 = vpop.xlane.xlu1 %972  ;;  %p1775_p5 = pnand %p1774_p4, %p1768_p1 }
 0x475   :  { %v982_v0 = vadd.f32 1e-05, %v978_v61  ;;  %v975_v1 = vmul.f32 0.008928572, %v973_v62 }
 0x477   :  { %1703 = vrsqrt.f32 %v982_v0  ;;  %v979_v2 = vsub.f32 %v975_v1, %v977_v63 }
 0x479   :  { %v983_v3 = vadd.f32 1e-05, %v979_v2 }
 0x47b   :  { %1705 = vrsqrt.f32 %v983_v3 }
 0x484   :  { %v1704_v5 = vpop.eup %1703 }
 0x485   :  { %v986_v6 = vmul.f32 %v1704_v5, %v980_v4 }
 0x487   :  { %v994_v11 = vmul.f32 %v1429_v7, %v986_v6 }
 0x488   :  { %v1706_v9 = vpop.eup %1705 }
 0x489   :  { %v987_v10 = vmul.f32 %v1706_v9, %v981_v8  ;;  %v1002_v16 = vadd.f32 %v1430_v12, %v994_v11 }
 0x48b   :  { %v995_v15 = vmul.f32 %v1429_v7, %v987_v10 }
 0x48d   :  { %v1003_v17 = vadd.f32 %v1430_v12, %v995_v15 }
 0x48f   :  { %v1004_v18 = vpack.c.bf16 %v1003_v17, %v1002_v16 }
 0x491   :  { %1252 = vmatmul.mubr.bf16.vlgmr.msra.gmra.mxu1 %v1004_v18  ;;  %1295 = vmatmul.mubr.bf16.vlgmr.msra.gmra.mxu0 %v1004_v18 }
 0x551   :  { %v1253_v25 = vpop.f32.mrf.mxu1  ;;  %v1296_v26 = vpop.f32.mrf.mxu0 }
 0x552   :  { %v1254_v29 = vadd.f32 %v1253_v25, %v1042_v13  ;;  %v1297_v30 = vadd.f32 %v1296_v26, %v1050_v45 }
 0x553   :  { %v1255_v27 = vpop.f32.mrf.mxu1  ;;  %v1298_v28 = vpop.f32.mrf.mxu0 }
 0x554   :  { %v1256_v31 = vadd.f32 %v1255_v27, %v1046_v19  ;;  %v1299_v32 = vadd.f32 %v1298_v28, %v1054_v49 }
 0x555   :  { %v1257_v33 = vpop.f32.mrf.mxu1  ;;  %v1300_v34 = vpop.f32.mrf.mxu0 }
 0x556   :  { %v1467_v23 = vpack.c.bf16 %v1256_v31, %v1254_v29  ;;  %v1468_v35 = vpack.c.bf16 %v1299_v32, %v1297_v30  ;;  %v1258_v20 = vadd.f32 %v1257_v33, %v1042_v13  ;;  %v1301_v21 = vadd.f32 %v1300_v34, %v1050_v45 }
 0x557   :  { %v1259_v36 = vpop.f32.mrf.mxu1  ;;  %v1302_v24 = vpop.f32.mrf.mxu0 }
 0x558   :  { %1329 = vst [vmem:[#allocation8] sm:$0xff] %v1467_v23  ;;  %1330 = vst [vmem:[#allocation8 + $0x8] sm:$0xff] %v1468_v35  ;;  %v1260_v22 = vadd.f32 %v1259_v36, %v1046_v19  ;;  %v1303_v37 = vadd.f32 %v1302_v24, %v1054_v49 }
 0x55a   :  { %v1469_v38 = vpack.c.bf16 %v1260_v22, %v1258_v20  ;;  %v1470_v39 = vpack.c.bf16 %v1303_v37, %v1301_v21 }
 0x55c   :  { %1331 = vst [vmem:[#allocation8 + $0x10] sm:$0xff] %v1469_v38  ;;  %1332 = vst [vmem:[#allocation8 + $0x18] sm:$0xff] %v1470_v39 }
 0x55d   :  { %1778 = shalt.err (!%p1775_p5)
}
 0x55e   :  { %1344 = dma.vmem_to_hbm [thread:$0]  %s1339_s12, 512, %s2043_s15, [#allocation4], %s1797_s28, %s1797_s28, %s1798_s29  }
 0x55f   :  { %1791 = dma.done.wait [#allocation4], 512  }
 0x560   :  { %1792 = vsyncadd [#allocation4], 4294966784 }
 0x561   :  { %1348 = vsyncpa [#allocation3], 1 }
 0x562   :  { %1349 = vsyncpa [#allocation6], 1 }
 0x563   :  { %1350 = vsyncpa [#allocation4], 1 }

</bundles_post_ra>
